<compile_context>
chip_gen: v6e
topology: v6e:2x2x1
jax: 0.10.0
libtpu: 0.0.40
codegen_flags: <defaults>
</compile_context>

<pallas_src>
import numpy as np

import jax
import jax.numpy as jnp
from jax.experimental import pallas as pl
from jax.experimental.pallas import tpu as pltpu


NUM_CLASSES = 6      # maskf2 hardcodes torch.arange(0, 6) and one_hot(..., 6)
EOS_COEF = 0.1
FOCAL_ALPHA = 0.25   # sigmoid_focal_loss defaults; gamma == 2 done as explicit square


# --------------------------------- fused kernel -----------------------------------------

def criterion_kernel(logitsT_ref, tgt_cls_ref, cls_w_ref,
                     src2d_ref, labels_ref, mask_cls_ref, valid_ref,
                     wh_ref, wwT_ref, out_ref):
    # ---------------- loss_labels: class-weighted cross entropy --------------------
    logits = logitsT_ref[...].astype(jnp.float32)          # (C1, M)  classes on sublanes
    tgt = tgt_cls_ref[...]                                   # (1, M)   int32
    w = cls_w_ref[...].astype(jnp.float32)                   # (C1, 1)
    C1, M = logits.shape

    mx = jnp.max(logits, axis=0, keepdims=True)
    z = logits - mx
    lse = jnp.log(jnp.sum(jnp.exp(z), axis=0, keepdims=True))
    logp = z - lse                                           # (C1, M) log-softmax

    cls_iota = jax.lax.broadcasted_iota(jnp.int32, (C1, M), 0)
    onehot = (cls_iota == tgt).astype(jnp.float32)           # (C1, M) no gather needed
    nll = -jnp.sum(onehot * logp, axis=0, keepdims=True)     # (1, M)
    wt = jnp.sum(onehot * w, axis=0, keepdims=True)          # (1, M) per-sample weight
    out_ref[0] = jnp.sum(wt * nll) / jnp.sum(wt)             # weighted-mean CE

    # ---------------- loss_masks: focal + dice over all matched masks --------------
    src = src2d_ref[...]                                     # (NMAX*Hm, Wm) bf16
    wh = wh_ref[...]                                         # (H, Hm)  bf16 bilinear rows
    wwT = wwT_ref[...]                                       # (Wm, W)  bf16 bilinear cols (pre-T)
    labels = labels_ref[...]                                 # (NMAX, H*W) int32 GT label map
    mcls = mask_cls_ref[...]                                 # (NMAX, 1)  int32 class per mask
    valid = valid_ref[...].astype(jnp.float32)               # (NMAX, 1)  1=real, 0=padding

    NMAX = labels.shape[0]
    H, Hm = wh.shape
    Wm, W = wwT.shape

    # F.interpolate(..., 'bilinear', align_corners=False) == wh @ m @ ww^T per mask:
    #   column interp as ONE big matmul over all masks, then a batched row interp.
    y = jnp.dot(src, wwT, preferred_element_type=jnp.float32)            # (NMAX*Hm, W)
    y = y.astype(jnp.bfloat16).reshape(NMAX, Hm, W)
    wh_b = jnp.broadcast_to(wh, (NMAX, H, Hm))
    x = jnp.einsum('nhk,nkw->nhw', wh_b, y,
                   preferred_element_type=jnp.float32)                   # (NMAX, H, W)
    x = x.reshape(NMAX, H * W)                                           # lane-dense pixels

    # one-hot GT mask computed in-kernel (replaces HBM one_hot + gather)
    t = (labels == mcls).astype(jnp.float32)                             # (NMAX, H*W)

    # stable sigmoid / BCE-with-logits: single exp + approx EUP reciprocal
    e = jnp.exp(-jnp.abs(x))
    inv1pe = pl.reciprocal(1.0 + e, approx=True)
    p = jnp.where(x >= 0.0, inv1pe, e * inv1pe)                          # sigmoid(x)
    ce = jnp.maximum(x, 0.0) - x * t + jnp.log(1.0 + e)
    p_t = p * t + (1.0 - p) * (1.0 - t)
    one_m = 1.0 - p_t
    alpha_t = FOCAL_ALPHA * t + (1.0 - FOCAL_ALPHA) * (1.0 - t)
    focal = alpha_t * ce * (one_m * one_m)                               # gamma == 2

    inv_npix = 1.0 / float(H * W)
    focal_per = jnp.sum(focal, axis=1, keepdims=True) * inv_npix         # (NMAX,1) mean(1)
    inter = jnp.sum(p * t, axis=1, keepdims=True)
    den = jnp.sum(p, axis=1, keepdims=True) + jnp.sum(t, axis=1, keepdims=True)
    dice_per = 1.0 - (2.0 * inter + 1.0) / (den + 1.0)                   # (NMAX,1)

    out_ref[1] = jnp.sum(focal_per * valid)                              # focal sum over masks
    out_ref[2] = jnp.sum(dice_per * valid)                               # dice sum over masks


def _criterion_call(logitsT, tgt_cls, cls_w, src2d, labels2d, mask_cls, valid, wh, wwT):
    return pl.pallas_call(
        criterion_kernel,
        out_shape=jax.ShapeDtypeStruct((3,), jnp.float32),
        in_specs=[pl.BlockSpec(memory_space=pltpu.MemorySpace.VMEM)] * 9,
        out_specs=pl.BlockSpec(memory_space=pltpu.MemorySpace.SMEM),
    )(logitsT, tgt_cls, cls_w, src2d, labels2d, mask_cls, valid, wh, wwT)


# ------------------------------ host-side helpers ----------------------------------------

def _bilinear_matrix(out_size, in_size):
    """Row-interpolation matrix matching torch bilinear, align_corners=False."""
    W = np.zeros((out_size, in_size), np.float32)
    scale = in_size / out_size
    for o in range(out_size):
        src = max((o + 0.5) * scale - 0.5, 0.0)
        i0 = min(int(np.floor(src)), in_size - 1)
        i1 = min(i0 + 1, in_size - 1)
        frac = src - i0
        W[o, i0] += 1.0 - frac
        W[o, i1] += frac
    return W


class SetCriterion:
    """Pallas/JAX port of maskf2.SetCriterion.forward (eval mode, single device)."""

    def __init__(self, num_classes=NUM_CLASSES, eos_coef=EOS_COEF,
                 weight_dict=None, losses=("labels", "masks"), max_masks=8):
        self.num_classes = num_classes
        self.eos_coef = eos_coef
        self.weight_dict = weight_dict or {}
        self.losses = losses
        self.max_masks = max_masks          # static pad target => no recompiles across calls
        ew = np.ones((num_classes + 1, 1), np.float32)
        ew[-1, 0] = eos_coef
        self.empty_weight = jnp.asarray(ew)
        self._interp_cache = {}             # (H, W, Hm, Wm) -> (wh bf16, wwT bf16)

    def _interp(self, H, W, Hm, Wm):
        key = (H, W, Hm, Wm)
        if key not in self._interp_cache:
            self._interp_cache[key] = (
                jnp.asarray(_bilinear_matrix(H, Hm), jnp.bfloat16),
                jnp.asarray(_bilinear_matrix(W, Wm).T, jnp.bfloat16))
        return self._interp_cache[key]

    def forward(self, outputs, targets, indices):
        pred_logits = outputs["pred_logits"]             # (B, Q, C+1)
        pred_masks = outputs["pred_masks"]                # (B, Q, Hm, Wm)
        B, Q, C1 = pred_logits.shape
        Hm, Wm = pred_masks.shape[-2:]
        H, W = targets.shape[-2:]

        # _get_src_permutation_idx / _get_tgt_permutation_idx (host side; matcher external)
        src_batch = np.concatenate(
            [np.full(len(s), i, np.int32) for i, (s, _) in enumerate(indices)])
        src_idx = np.concatenate([np.asarray(s, np.int32) for s, _ in indices])
        tgt_batch = np.concatenate(
            [np.full(len(t), i, np.int32) for i, (_, t) in enumerate(indices)])
        tgt_idx = np.concatenate([np.asarray(t, np.int32) for _, t in indices])
        N = int(src_idx.shape[0])
        NMAX = self.max_masks
        assert 0 < N <= NMAX, "increase max_masks"

        # num_masks is hard-coded to 6 in the reference; world_size = 1, clamp(min=1)
        num_masks = max(6.0 / 1.0, 1.0)

        # ---- CE inputs: (C+1, B*Q) lane-dense logits; target class per query ----
        target_classes = np.full((B, Q), self.num_classes, np.int32)
        target_classes[src_batch, src_idx] = tgt_idx          # torch.arange(0,6)[J] == J
        logitsT = jnp.transpose(pred_logits.reshape(B * Q, C1)).astype(jnp.float32)
        tgt_cls = jnp.asarray(target_classes.reshape(1, B * Q))

        # ---- mask inputs, padded to static NMAX (padding rows get valid == 0) ----
        src_masks = pred_masks[src_batch, src_idx].astype(jnp.bfloat16)   # (N, Hm, Wm)
        src_pad = jnp.zeros((NMAX, Hm, Wm), jnp.bfloat16).at[:N].set(src_masks)
        src2d = src_pad.reshape(NMAX * Hm, Wm)

        labels_pm = targets[tgt_batch].reshape(N, H * W).astype(jnp.int32)  # GT labels per mask
        labels2d = jnp.zeros((NMAX, H * W), jnp.int32).at[:N].set(labels_pm)
        mask_cls = np.full((NMAX, 1), -1, np.int32)
        mask_cls[:N, 0] = tgt_idx              # in-kernel (labels == cls) replaces one_hot+gather
        valid = np.zeros((NMAX, 1), np.float32)
        valid[:N, 0] = 1.0

        wh, wwT = self._interp(H, W, Hm, Wm)

        out = _criterion_call(logitsT, tgt_cls, self.empty_weight,
                              src2d, labels2d, jnp.asarray(mask_cls),
                              jnp.asarray(valid), wh, wwT)

        losses = {}
        if "labels" in self.losses:
            losses["loss_ce"] = out[0]
        if "masks" in self.losses:
            losses["loss_mask"] = out[1] / num_masks
            losses["loss_dice"] = out[2] / num_masks
        # TODO(synk): 'aux_outputs' loop requires the external Hungarian matcher; skipped.
        return losses


# --------------------------------------- demo --------------------------------------------

if __name__ == "__main__":
    B, Q, Hm, Wm, H, W = 2, 8, 8, 8, 16, 16
    C1 = NUM_CLASSES + 1

    key = jax.random.PRNGKey(0)
    k1, k2, k3 = jax.random.split(key, 3)
    outputs = {
        "pred_logits": jax.random.normal(k1, (B, Q, C1), jnp.float32),
        "pred_masks": jax.random.normal(k2, (B, Q, Hm, Wm), jnp.float32),
    }
    targets = jax.random.randint(k3, (B, H, W), 0, NUM_CLASSES, jnp.int32)

    # deterministic stand-in for the external Hungarian matcher's output
    indices = [
        (np.array([0, 3, 5], np.int32), np.array([2, 0, 4], np.int32)),
        (np.array([1, 4], np.int32), np.array([1, 3], np.int32)),
    ]

    criterion = SetCriterion(max_masks=8)
    losses = criterion.forward(outputs, targets, indices)
    losses = jax.tree_util.tree_map(jax.block_until_ready, losses)

    for name in ("loss_ce", "loss_mask", "loss_dice"):
        assert name in losses and bool(jnp.isfinite(losses[name])), f"bad {name}"
    print("KERNEL_OK")
</pallas_src>

<mosaic_0001>
module attributes {stable_mosaic.version = 11 : i64} {
  func.func @criterion_kernel(%arg0: memref<7x16xf32, #tpu.memory_space<vmem>>, %arg1: memref<1x16xi32, #tpu.memory_space<vmem>>, %arg2: memref<7x1xf32, #tpu.memory_space<vmem>>, %arg3: memref<64x8xbf16, #tpu.memory_space<vmem>>, %arg4: memref<8x256xi32, #tpu.memory_space<vmem>>, %arg5: memref<8x1xi32, #tpu.memory_space<vmem>>, %arg6: memref<8x1xf32, #tpu.memory_space<vmem>>, %arg7: memref<16x8xbf16, #tpu.memory_space<vmem>>, %arg8: memref<8x16xbf16, #tpu.memory_space<vmem>>, %arg9: memref<3xf32, #tpu.memory_space<smem>>) attributes {dimension_semantics = [], scalar_prefetch = 0 : i64, scratch_operands = 0 : i64, tpu.core_type = #tpu.core_type<tc>} {
    %c0 = arith.constant 0 : index
    %c0_0 = arith.constant 0 : index
    %0 = vector.load %arg0[%c0, %c0_0] : memref<7x16xf32, #tpu.memory_space<vmem>>, vector<7x16xf32>
    %c0_1 = arith.constant 0 : index
    %c0_2 = arith.constant 0 : index
    %1 = vector.load %arg1[%c0_1, %c0_2] : memref<1x16xi32, #tpu.memory_space<vmem>>, vector<1x16xi32>
    %c0_3 = arith.constant 0 : index
    %c0_4 = arith.constant 0 : index
    %2 = vector.load %arg2[%c0_3, %c0_4] : memref<7x1xf32, #tpu.memory_space<vmem>>, vector<7x1xf32>
    %cst = arith.constant dense<0xFF800000> : vector<16xf32>
    %3 = vector.multi_reduction <maximumf>, %0, %cst [0] : vector<7x16xf32> to vector<16xf32>
    %4 = vector.shape_cast %3 : vector<16xf32> to vector<1x16xf32>
    %5 = vector.broadcast %4 : vector<1x16xf32> to vector<7x16xf32>
    %6 = arith.subf %0, %5 : vector<7x16xf32>
    %7 = math.exp %6 : vector<7x16xf32>
    %cst_5 = arith.constant dense<0.000000e+00> : vector<16xf32>
    %8 = vector.multi_reduction <add>, %7, %cst_5 [0] : vector<7x16xf32> to vector<16xf32>
    %9 = vector.shape_cast %8 : vector<16xf32> to vector<1x16xf32>
    %10 = math.log %9 : vector<1x16xf32>
    %11 = vector.broadcast %10 : vector<1x16xf32> to vector<7x16xf32>
    %12 = arith.subf %6, %11 : vector<7x16xf32>
    %13 = tpu.iota {dimensions = array<i32: 0>} : vector<7x16xi32>
    %14 = vector.broadcast %1 : vector<1x16xi32> to vector<7x16xi32>
    %15 = arith.cmpi eq, %13, %14 : vector<7x16xi32>
    %16 = arith.extui %15 : vector<7x16xi1> to vector<7x16xi32>
    %17 = arith.sitofp %16 : vector<7x16xi32> to vector<7x16xf32>
    %18 = arith.mulf %17, %12 : vector<7x16xf32>
    %cst_6 = arith.constant dense<0.000000e+00> : vector<16xf32>
    %19 = vector.multi_reduction <add>, %18, %cst_6 [0] : vector<7x16xf32> to vector<16xf32>
    %20 = vector.shape_cast %19 : vector<16xf32> to vector<1x16xf32>
    %cst_7 = arith.constant 0.000000e+00 : f32
    %21 = vector.broadcast %cst_7 : f32 to vector<1x16xf32>
    %22 = arith.subf %21, %20 : vector<1x16xf32>
    %23 = vector.broadcast %2 : vector<7x1xf32> to vector<7x16xf32>
    %24 = arith.mulf %17, %23 : vector<7x16xf32>
    %cst_8 = arith.constant dense<0.000000e+00> : vector<16xf32>
    %25 = vector.multi_reduction <add>, %24, %cst_8 [0] : vector<7x16xf32> to vector<16xf32>
    %26 = vector.shape_cast %25 : vector<16xf32> to vector<1x16xf32>
    %27 = arith.mulf %26, %22 : vector<1x16xf32>
    %28 = vector.shape_cast %27 : vector<1x16xf32> to vector<1x1x16xf32>
    %cst_9 = arith.constant dense<0.000000e+00> : vector<1xf32>
    %29 = vector.multi_reduction <add>, %28, %cst_9 [1, 2] : vector<1x1x16xf32> to vector<1xf32>
    %30 = vector.shape_cast %29 : vector<1xf32> to vector<1x1x1xf32>
    %31 = vector.extract %30[0, 0, 0] : f32 from vector<1x1x1xf32>
    %32 = vector.shape_cast %26 : vector<1x16xf32> to vector<1x1x16xf32>
    %cst_10 = arith.constant dense<0.000000e+00> : vector<1xf32>
    %33 = vector.multi_reduction <add>, %32, %cst_10 [1, 2] : vector<1x1x16xf32> to vector<1xf32>
    %34 = vector.shape_cast %33 : vector<1xf32> to vector<1x1x1xf32>
    %35 = vector.extract %34[0, 0, 0] : f32 from vector<1x1x1xf32>
    %36 = arith.divf %31, %35 : f32
    %c0_11 = arith.constant 0 : index
    %37 = memref.load %arg9[%c0_11] : memref<3xf32, #tpu.memory_space<smem>>
    memref.store %36, %arg9[%c0_11] : memref<3xf32, #tpu.memory_space<smem>>
    %c0_12 = arith.constant 0 : index
    %c0_13 = arith.constant 0 : index
    %38 = vector.load %arg3[%c0_12, %c0_13] : memref<64x8xbf16, #tpu.memory_space<vmem>>, vector<64x8xbf16>
    %c0_14 = arith.constant 0 : index
    %c0_15 = arith.constant 0 : index
    %39 = vector.load %arg7[%c0_14, %c0_15] : memref<16x8xbf16, #tpu.memory_space<vmem>>, vector<16x8xbf16>
    %c0_16 = arith.constant 0 : index
    %c0_17 = arith.constant 0 : index
    %40 = vector.load %arg8[%c0_16, %c0_17] : memref<8x16xbf16, #tpu.memory_space<vmem>>, vector<8x16xbf16>
    %c0_18 = arith.constant 0 : index
    %c0_19 = arith.constant 0 : index
    %41 = vector.load %arg4[%c0_18, %c0_19] : memref<8x256xi32, #tpu.memory_space<vmem>>, vector<8x256xi32>
    %c0_20 = arith.constant 0 : index
    %c0_21 = arith.constant 0 : index
    %42 = vector.load %arg5[%c0_20, %c0_21] : memref<8x1xi32, #tpu.memory_space<vmem>>, vector<8x1xi32>
    %c0_22 = arith.constant 0 : index
    %c0_23 = arith.constant 0 : index
    %43 = vector.load %arg6[%c0_22, %c0_23] : memref<8x1xf32, #tpu.memory_space<vmem>>, vector<8x1xf32>
    %cst_24 = arith.constant dense<0.000000e+00> : vector<64x16xf32>
    %44 = tpu.matmul %38, %40, %cst_24 {dimension_numbers = #tpu.dot_dimension_numbers<[1], [0], [0], [1], [0, 0, 1, 1], [], []>} : vector<64x8xbf16>, vector<8x16xbf16>, vector<64x16xf32> -> vector<64x16xf32>
    %45 = arith.truncf %44 : vector<64x16xf32> to vector<64x16xbf16>
    %46 = vector.shape_cast %45 : vector<64x16xbf16> to vector<8x8x16xbf16>
    %47 = vector.shape_cast %39 : vector<16x8xbf16> to vector<1x16x8xbf16>
    %48 = vector.broadcast %47 : vector<1x16x8xbf16> to vector<8x16x8xbf16>
    "tpu.trace_start"() <{level = 10 : i32, message = "nhk,nkw->nhw"}> : () -> ()
    %cst_25 = arith.constant dense<0.000000e+00> : vector<8x16x16xf32>
    %49 = tpu.matmul %48, %46, %cst_25 {dimension_numbers = #tpu.dot_dimension_numbers<[2], [1], [1], [2], [0, 0, 0, 1, 1, 2], [0], [0]>} : vector<8x16x8xbf16>, vector<8x8x16xbf16>, vector<8x16x16xf32> -> vector<8x16x16xf32>
    "tpu.trace_stop"() : () -> ()
    %50 = vector.shape_cast %49 : vector<8x16x16xf32> to vector<8x256xf32>
    %51 = vector.broadcast %42 : vector<8x1xi32> to vector<8x256xi32>
    %52 = arith.cmpi eq, %41, %51 : vector<8x256xi32>
    %53 = arith.extui %52 : vector<8x256xi1> to vector<8x256xi32>
    %54 = arith.sitofp %53 : vector<8x256xi32> to vector<8x256xf32>
    %55 = math.absf %50 : vector<8x256xf32>
    %cst_26 = arith.constant 0.000000e+00 : f32
    %56 = vector.broadcast %cst_26 : f32 to vector<8x256xf32>
    %57 = arith.subf %56, %55 : vector<8x256xf32>
    %58 = math.exp %57 : vector<8x256xf32>
    %cst_27 = arith.constant 1.000000e+00 : f32
    %59 = vector.broadcast %cst_27 : f32 to vector<8x256xf32>
    %60 = arith.addf %59, %58 : vector<8x256xf32>
    %61 = tpu.reciprocal %60 {approx = true} : vector<8x256xf32> -> vector<8x256xf32>
    %cst_28 = arith.constant 0.000000e+00 : f32
    %62 = vector.broadcast %cst_28 : f32 to vector<8x256xf32>
    %63 = arith.cmpf oge, %50, %62 : vector<8x256xf32>
    %64 = arith.mulf %58, %61 : vector<8x256xf32>
    %65 = arith.select %63, %61, %64 : vector<8x256xi1>, vector<8x256xf32>
    %cst_29 = arith.constant 0.000000e+00 : f32
    %66 = vector.broadcast %cst_29 : f32 to vector<8x256xf32>
    %67 = arith.maximumf %50, %66 : vector<8x256xf32>
    %68 = arith.mulf %50, %54 : vector<8x256xf32>
    %69 = arith.subf %67, %68 : vector<8x256xf32>
    %cst_30 = arith.constant 1.000000e+00 : f32
    %70 = vector.broadcast %cst_30 : f32 to vector<8x256xf32>
    %71 = arith.addf %70, %58 : vector<8x256xf32>
    %72 = math.log %71 : vector<8x256xf32>
    %73 = arith.addf %69, %72 : vector<8x256xf32>
    %74 = arith.mulf %65, %54 : vector<8x256xf32>
    %cst_31 = arith.constant 1.000000e+00 : f32
    %75 = vector.broadcast %cst_31 : f32 to vector<8x256xf32>
    %76 = arith.subf %75, %65 : vector<8x256xf32>
    %cst_32 = arith.constant 1.000000e+00 : f32
    %77 = vector.broadcast %cst_32 : f32 to vector<8x256xf32>
    %78 = arith.subf %77, %54 : vector<8x256xf32>
    %79 = arith.mulf %76, %78 : vector<8x256xf32>
    %80 = arith.addf %74, %79 : vector<8x256xf32>
    %cst_33 = arith.constant 1.000000e+00 : f32
    %81 = vector.broadcast %cst_33 : f32 to vector<8x256xf32>
    %82 = arith.subf %81, %80 : vector<8x256xf32>
    %cst_34 = arith.constant 2.500000e-01 : f32
    %83 = vector.broadcast %cst_34 : f32 to vector<8x256xf32>
    %84 = arith.mulf %83, %54 : vector<8x256xf32>
    %cst_35 = arith.constant 1.000000e+00 : f32
    %85 = vector.broadcast %cst_35 : f32 to vector<8x256xf32>
    %86 = arith.subf %85, %54 : vector<8x256xf32>
    %cst_36 = arith.constant 7.500000e-01 : f32
    %87 = vector.broadcast %cst_36 : f32 to vector<8x256xf32>
    %88 = arith.mulf %87, %86 : vector<8x256xf32>
    %89 = arith.addf %84, %88 : vector<8x256xf32>
    %90 = arith.mulf %89, %73 : vector<8x256xf32>
    %91 = arith.mulf %82, %82 : vector<8x256xf32>
    %92 = arith.mulf %90, %91 : vector<8x256xf32>
    %cst_37 = arith.constant dense<0.000000e+00> : vector<8xf32>
    %93 = vector.multi_reduction <add>, %92, %cst_37 [1] : vector<8x256xf32> to vector<8xf32>
    %94 = vector.shape_cast %93 : vector<8xf32> to vector<8x1xf32>
    %cst_38 = arith.constant 3.906250e-03 : f32
    %95 = vector.broadcast %cst_38 : f32 to vector<8x1xf32>
    %96 = arith.mulf %94, %95 : vector<8x1xf32>
    %97 = arith.mulf %65, %54 : vector<8x256xf32>
    %cst_39 = arith.constant dense<0.000000e+00> : vector<8xf32>
    %98 = vector.multi_reduction <add>, %97, %cst_39 [1] : vector<8x256xf32> to vector<8xf32>
    %99 = vector.shape_cast %98 : vector<8xf32> to vector<8x1xf32>
    %cst_40 = arith.constant dense<0.000000e+00> : vector<8xf32>
    %100 = vector.multi_reduction <add>, %65, %cst_40 [1] : vector<8x256xf32> to vector<8xf32>
    %101 = vector.shape_cast %100 : vector<8xf32> to vector<8x1xf32>
    %cst_41 = arith.constant dense<0.000000e+00> : vector<8xf32>
    %102 = vector.multi_reduction <add>, %54, %cst_41 [1] : vector<8x256xf32> to vector<8xf32>
    %103 = vector.shape_cast %102 : vector<8xf32> to vector<8x1xf32>
    %104 = arith.addf %101, %103 : vector<8x1xf32>
    %cst_42 = arith.constant 2.000000e+00 : f32
    %105 = vector.broadcast %cst_42 : f32 to vector<8x1xf32>
    %106 = arith.mulf %105, %99 : vector<8x1xf32>
    %cst_43 = arith.constant 1.000000e+00 : f32
    %107 = vector.broadcast %cst_43 : f32 to vector<8x1xf32>
    %108 = arith.addf %106, %107 : vector<8x1xf32>
    %cst_44 = arith.constant 1.000000e+00 : f32
    %109 = vector.broadcast %cst_44 : f32 to vector<8x1xf32>
    %110 = arith.addf %104, %109 : vector<8x1xf32>
    %111 = arith.divf %108, %110 : vector<8x1xf32>
    %cst_45 = arith.constant 1.000000e+00 : f32
    %112 = vector.broadcast %cst_45 : f32 to vector<8x1xf32>
    %113 = arith.subf %112, %111 : vector<8x1xf32>
    %114 = arith.mulf %96, %43 : vector<8x1xf32>
    %115 = vector.shape_cast %114 : vector<8x1xf32> to vector<1x8x1xf32>
    %cst_46 = arith.constant dense<0.000000e+00> : vector<1xf32>
    %116 = vector.multi_reduction <add>, %115, %cst_46 [1, 2] : vector<1x8x1xf32> to vector<1xf32>
    %117 = vector.shape_cast %116 : vector<1xf32> to vector<1x1x1xf32>
    %118 = vector.extract %117[0, 0, 0] : f32 from vector<1x1x1xf32>
    %c1 = arith.constant 1 : index
    %119 = memref.load %arg9[%c1] : memref<3xf32, #tpu.memory_space<smem>>
    memref.store %118, %arg9[%c1] : memref<3xf32, #tpu.memory_space<smem>>
    %120 = arith.mulf %113, %43 : vector<8x1xf32>
    %121 = vector.shape_cast %120 : vector<8x1xf32> to vector<1x8x1xf32>
    %cst_47 = arith.constant dense<0.000000e+00> : vector<1xf32>
    %122 = vector.multi_reduction <add>, %121, %cst_47 [1, 2] : vector<1x8x1xf32> to vector<1xf32>
    %123 = vector.shape_cast %122 : vector<1xf32> to vector<1x1x1xf32>
    %124 = vector.extract %123[0, 0, 0] : f32 from vector<1x1x1xf32>
    %c2 = arith.constant 2 : index
    %125 = memref.load %arg9[%c2] : memref<3xf32, #tpu.memory_space<smem>>
    memref.store %124, %arg9[%c2] : memref<3xf32, #tpu.memory_space<smem>>
    return
  }
}

</mosaic_0001>

<bundles_post_ra>
// kernel: tpu_custom_call.1
= control target key start
LH: loop header
LB: loop body
LE: loop exit
PB: predicated region body
PF: predicated region fallthrough
CT: control target
= control target key end

     0   :  { %vm165_vm0 = vcmask 1043456   ;;  %vm152_vm1 = vcmask 64512   ;;  %s1528_s0 = inlined_call_operand.vmem [shape: f32[7,16], index: 0, kind: input, shape index: {}]   ;;  %s1529_s1 = inlined_call_operand.vmem [shape: s32[1,16], index: 1, kind: input, shape index: {}]   ;;  %s1530_s2 = inlined_call_operand.vmem [shape: f32[7,1], index: 2, kind: input, shape index: {}]   ;;  %s1531_s3 = inlined_call_operand.vmem [shape: bf16[64,8], index: 3, kind: input, shape index: {}]   ;;  %s1532_s4 = inlined_call_operand.vmem [shape: s32[8,256], index: 4, kind: input, shape index: {}]   ;;  %s1533_s5 = inlined_call_operand.vmem [shape: s32[8,1], index: 5, kind: input, shape index: {}]   ;;  %s1534_s6 = inlined_call_operand.vmem [shape: f32[8,1], index: 6, kind: input, shape index: {}]   ;;  %s1535_s7 = inlined_call_operand.vmem [shape: bf16[16,8], index: 7, kind: input, shape index: {}]   ;;  %s1536_s8 = inlined_call_operand.vmem [shape: bf16[8,16], index: 8, kind: input, shape index: {}]   ;;  %s1537_s9 = inlined_call_operand.hbm [shape: f32[3], index: 9, kind: output, shape index: {}]  }
   0x1   :  { %v127_v0 = vld [vmem:[%s1536_s8] sm:$0xf]  ;;  %v1233_v3 = vld [vmem:[%s1531_s3 + $0x8] sm:$0xff]   ;;  %v1234_v4 = vld [vmem:[%s1531_s3 + $0x10] sm:$0xff]  }
   0x2   :  { %v1232_v1 = vld [vmem:[%s1531_s3] sm:$0xff]   ;;  %1206 = vmatprep.subr.msk.bf16.mxu0 %vm165_vm0, %v127_v0  ;;  %v167_v2 = vsel %vm165_vm0, %v127_v0, 0 }
   0x3   :  { %1149 = vmatpush3.bf16.msra.mxu0 %v167_v2  ;;  %1150 = vmatprep.mubr.msk.bf16.mxu0 %vm152_vm1, %v1232_v1 }
   0x6   :  { %1151 = vmatmul.mubr.msk.bf16.vlgmr.msra.gmra.mxu0 %vm152_vm1, %v1233_v3 }
   0x7   :  { %14 = vsyncpa [#allocation3], 0  ;;  %1154 = vmatprep.mubr.msk.bf16.mxu0 %vm152_vm1, %v1234_v4  ;;  %v1235_v5 = vld [vmem:[%s1531_s3 + $0x18] sm:$0xff]   ;;  %v1267_v6 = vmov 0.0   ;;  %vm1268_vm2 = vmmov 0   ;;  %v1236_v12 = vld [vmem:[%s1535_s7] sm:$0xff]   ;;  %v58_v55 = vlaneseq }
   0x8   :  { %1170 = vmatprep.subr.bf16.mxu0 %v1267_v6  ;;  %1158 = vmatprep.subr.bf16.mxu1 %v1267_v6  ;;  %v1269_v32 = vmov 0   ;;  %v1270_v56 = vmov 1983009808   ;;  %v1271_v0 = vmov 1934713408   ;;  %s1272_s7 = smov 32  }
   0x9   :  { %1160 = vmatprep.mubr.msk.bf16.mxu1 %vm1268_vm2, %v1267_v6  ;;  %1230 = vset.pattern.permute.xlu0 %v1269_v32  ;;  %v621_v57 = vunpack.c.l.s4 %v1270_v56  ;;  %v1406_v61 = vshrl.u32 %v58_v55, 7  ;;  %v685_v1 = vunpack.c.l.s4 %v1271_v0  ;;  %s1273_s19 = smov 16   ;;  %s1274_s20 = smov 48   ;;  %vm37_vm3 = vcmask 129024  }
   0xa   :  { %1231 = vset.pattern.permute.xlu1 %v1269_v32  ;;  %s1275_s21 = smov 64   ;;  %s1276_s22 = smov 80   ;;  %vm946_vm4 = vcmask 130048   ;;  %vm948_vm5 = vcmask 261120   ;;  %vm950_vm6 = vcmask 392192   ;;  %vm952_vm7 = vcmask 523264  }
   0xb   :  { %v622_v62 = vunpack.c.0.s8 %v621_v57  ;;  %s1277_s23 = smov 96   ;;  %s1278_s24 = smov 112   ;;  %vm954_vm8 = vcmask 654336   ;;  %vm956_vm9 = vcmask 785408   ;;  %vm958_vm10 = vcmask 916480  }
   0xc   :  { %s1279_s17 = smov [#allocation2]  }
   0xe   :  { %1155 = vmatmul.mubr.msk.bf16.gmra.mxu0 %vm152_vm1, %v1235_v5 }
   0xf   :  { %1172 = vmatprep.mubr.msk.bf16.mxu0 %vm1268_vm2, %v1267_v6 }
  0xc6   :  { %v1152_v7 = vpop.f32.mrf.mxu0 }
  0xc7   :  { %v1121_v8 = vpack.c.bf16 %v1152_v7, %v1152_v7  ;;  %v625_v7 = vsub.s32 %v622_v62, %v1406_v61 }
  0xc8   :  { %v203_v9 = vpop.f32.mrf.mxu0 }
  0xc9   :  { %v355_v10 = vsel %vm165_vm0, %v1121_v8, 0  ;;  %v1119_v11 = vpack.c.bf16 %v203_v9, %v203_v9  ;;  %v686_v9 = vunpack.c.0.s8 %v685_v1 }
  0xca   :  { %v1153_v13 = vpop.f32.mrf.mxu0  ;;  %1171 = vmatpush3.bf16.msra.mxu0 %v355_v10 }
  0xcb   :  { %v267_v14 = vsel %vm165_vm0, %v1119_v11, 0  ;;  %1182 = vmatprep.subr.bf16.mxu0 %v1267_v6  ;;  %v1122_v23 = vpack.c.bf16 %v1153_v13, %v1153_v13 }
  0xcc   :  { %v206_v15 = vpop.f32.mrf.mxu0  ;;  %1159 = vmatpush3.bf16.msra.mxu1 %v267_v14 }
  0xcd   :  { %v1120_v16 = vpack.c.bf16 %v206_v15, %v206_v15  ;;  %1164 = vmatprep.subr.bf16.mxu1 %v1267_v6  ;;  %1173 = vmatmul.mubr.msk.bf16.vlgmr.msra.gmra.mxu0 %vm152_vm1, %v1236_v12  ;;  %v399_v27 = vsel %vm165_vm0, %v1122_v23, 0 }
  0xce   :  { %v1156_v17 = vpop.f32.mrf.mxu0  ;;  %1184 = vmatprep.mubr.msk.bf16.mxu0 %vm1268_vm2, %v1267_v6 }
  0xcf   :  { %v311_v18 = vsel %vm165_vm0, %v1120_v16, 0  ;;  %1161 = vmatmul.mubr.msk.bf16.vlgmr.msra.gmra.mxu1 %vm152_vm1, %v1236_v12  ;;  %v1125_v20 = vpack.c.bf16 %v1156_v17, %v1156_v17 }
  0xd0   :  { %1165 = vmatpush3.bf16.msra.mxu1 %v311_v18  ;;  %v219_v19 = vpop.f32.mrf.mxu0  ;;  %1166 = vmatprep.mubr.msk.bf16.mxu1 %vm1268_vm2, %v1267_v6 }
  0xd1   :  { %v1123_v21 = vpack.c.bf16 %v219_v19, %v219_v19  ;;  %1176 = vmatprep.subr.bf16.mxu1 %v1267_v6  ;;  %v531_v25 = vsel %vm165_vm0, %v1125_v20, 0 }
  0xd2   :  { %v1157_v22 = vpop.f32.mrf.mxu0 }
  0xd3   :  { %v443_v24 = vsel %vm165_vm0, %v1123_v21, 0  ;;  %v1126_v30 = vpack.c.bf16 %v1157_v22, %v1157_v22  ;;  %v1416_v22 = vsub.s32 %v686_v9, %v1406_v61 }
  0xd4   :  { %1183 = vmatpush3.bf16.msra.mxu0 %v443_v24  ;;  %v222_v26 = vpop.f32.mrf.mxu0 }
  0xd5   :  { %1194 = vmatprep.subr.bf16.mxu0 %v1267_v6  ;;  %v1124_v28 = vpack.c.bf16 %v222_v26, %v222_v26  ;;  %v575_v31 = vsel %vm165_vm0, %v1126_v30, 0 }
  0xd7   :  { %1167 = vmatmul.mubr.msk.bf16.vlgmr.msra.gmra.mxu1 %vm152_vm1, %v1236_v12  ;;  %1185 = vmatmul.mubr.msk.bf16.vlgmr.msra.gmra.mxu0 %vm152_vm1, %v1236_v12  ;;  %v487_v29 = vsel %vm165_vm0, %v1124_v28, 0  ;;  %vm90_vm0 = vcmask 122880  }
  0xd8   :  { %1177 = vmatpush3.bf16.msra.mxu1 %v399_v27  ;;  %1195 = vmatpush3.bf16.msra.mxu0 %v531_v25 }
  0xd9   :  { %1178 = vmatprep.mubr.msk.bf16.mxu1 %vm1268_vm2, %v1267_v6  ;;  %1188 = vmatprep.subr.bf16.mxu1 %v1267_v6 }
  0xda   :  { %1196 = vmatprep.mubr.msk.bf16.mxu0 %vm1268_vm2, %v1267_v6 }
  0xdf   :  { %1179 = vmatmul.mubr.msk.bf16.vlgmr.msra.gmra.mxu1 %vm152_vm1, %v1236_v12  ;;  %1197 = vmatmul.mubr.msk.bf16.vlgmr.msra.gmra.mxu0 %vm152_vm1, %v1236_v12 }
  0xe0   :  { %1189 = vmatpush3.bf16.msra.mxu1 %v487_v29  ;;  %1190 = vmatprep.mubr.msk.bf16.mxu1 %vm1268_vm2, %v1267_v6 }
  0xe1   :  { %1200 = vmatprep.subr.bf16.mxu1 %v1267_v6 }
  0xe7   :  { %1191 = vmatmul.mubr.msk.bf16.vlgmr.msra.gmra.mxu1 %vm152_vm1, %v1236_v12 }
  0xe8   :  { %1201 = vmatpush3.bf16.msra.mxu1 %v575_v31  ;;  %1202 = vmatprep.mubr.msk.bf16.mxu1 %vm1268_vm2, %v1267_v6 }
  0xef   :  { %1203 = vmatmul.mubr.msk.bf16.vlgmr.msra.gmra.mxu1 %vm152_vm1, %v1236_v12  ;;  %vm1051_vm1 = vcmask 7168  }
 0x18d   :  { %v391_v33 = vpop.f32.mrf.mxu0 }
 0x18f   :  { %v303_v34 = vpop.f32.mrf.mxu1  ;;  %v1174_v35 = vpop.f32.mrf.mxu0 }
 0x190   :  { %v618_v4 = vcombine.low %v303_v34, %v391_v33  ;;  %v619_v5 = vcombine.high %v303_v34, %v391_v33 }
 0x191   :  { %v1162_v36 = vpop.f32.mrf.mxu1  ;;  %v1394_v37 = vpop.f32.mrf.mxu0 }
 0x192   :  { %v626_v19 = vrot.slane %v618_v4, %v625_v7  ;;  %v1413_v20 = vrot.slane %v619_v5, %v625_v7 }
 0x193   :  { %v1396_v38 = vpop.f32.mrf.mxu1  ;;  %v1175_v39 = vpop.f32.mrf.mxu0 }
 0x194   :  { %v754_v11 = vcombine.low %v1396_v38, %v1394_v37  ;;  %v755_v23 = vcombine.high %v1396_v38, %v1394_v37 }
 0x195   :  { %v1163_v40 = vpop.f32.mrf.mxu1 }
 0x196   :  { %v762_v27 = vrot.slane %v754_v11, %v625_v7 }
 0x197   :  { %v347_v41 = vpop.f32.mrf.mxu1  ;;  %v479_v42 = vpop.f32.mrf.mxu0 }
 0x199   :  { %v1168_v43 = vpop.f32.mrf.mxu1  ;;  %v1186_v44 = vpop.f32.mrf.mxu0 }
 0x19b   :  { %v1398_v45 = vpop.f32.mrf.mxu1  ;;  %v1400_v46 = vpop.f32.mrf.mxu0 }
 0x19d   :  { %v1169_v47 = vpop.f32.mrf.mxu1  ;;  %v1187_v48 = vpop.f32.mrf.mxu0 }
 0x19f   :  { %v435_v49 = vpop.f32.mrf.mxu1  ;;  %v567_v50 = vpop.f32.mrf.mxu0 }
 0x1a0   :  { %v634_v2 = vcombine.low %v347_v41, %v435_v49  ;;  %v650_v13 = vcombine.low %v479_v42, %v567_v50  ;;  %v635_v15 = vcombine.high %v347_v41, %v435_v49  ;;  %v651_v16 = vcombine.high %v479_v42, %v567_v50 }
 0x1a1   :  { %v1180_v51 = vpop.f32.mrf.mxu1  ;;  %v1198_v52 = vpop.f32.mrf.mxu0 }
 0x1a2   :  { %v642_v12 = vrot.slane %v634_v2, %v625_v7  ;;  %v658_v28 = vrot.slane %v650_v13, %v625_v7  ;;  %v1422_v32 = vrot.slane %v635_v15, %v625_v7  ;;  %v1424_v33 = vrot.slane %v651_v16, %v625_v7 }
 0x1a3   :  { %v1402_v53 = vpop.f32.mrf.mxu1  ;;  %v1404_v54 = vpop.f32.mrf.mxu0  ;;  %v769_v2 = vrot.slane %v755_v23, %v625_v7 }
 0x1a4   :  { %v770_v10 = vcombine.low %v1398_v45, %v1402_v53  ;;  %v786_v25 = vcombine.low %v1400_v46, %v1404_v54  ;;  %v683_v30 = vcombine.high %v626_v19, %v642_v12  ;;  %v682_v31 = vcombine.low %v626_v19, %v642_v12 }
 0x1a5   :  { %v1181_v58 = vpop.f32.mrf.mxu1  ;;  %v1199_v59 = vpop.f32.mrf.mxu0  ;;  %v771_v36 = vcombine.high %v1398_v45, %v1402_v53  ;;  %v787_v42 = vcombine.high %v1400_v46, %v1404_v54  ;;  %v698_v57 = vcombine.low %v1413_v20, %v1422_v32 }
 0x1a6   :  { %v778_v24 = vrot.slane %v770_v10, %v625_v7  ;;  %v794_v43 = vrot.slane %v786_v25, %v625_v7  ;;  %v697_v47 = vrot.slane %v683_v30, %v1416_v22  ;;  %v1435_v49 = vrot.slane %v682_v31, %v1416_v22  ;;  %v130_v31 = vld [vmem:[%s1533_s5] sm:$0xff] }
 0x1a7   :  { %v523_v60 = vpop.f32.mrf.mxu1  ;;  %v801_v62 = vrot.slane %v787_v42, %v625_v7  ;;  %v706_v10 = vrot.slane %v698_v57, %v1416_v22 }
 0x1a8   :  { %v819_v41 = vcombine.high %v762_v27, %v778_v24  ;;  %v818_v45 = vcombine.low %v762_v27, %v778_v24 }
 0x1a9   :  { %v1192_v63 = vpop.f32.mrf.mxu1 }
 0x1aa   :  { %v833_v58 = vrot.slane %v819_v41, %v1416_v22  ;;  %v1455_v1 = vrot.slane %v818_v45, %v1416_v22 }
 0x1ab   :  { %v526_v3 = vpop.f32.mrf.mxu1 }
 0x1ad   :  { %v1193_v8 = vpop.f32.mrf.mxu1 }
 0x1af   :  { %v611_v14 = vpop.f32.mrf.mxu1 }
 0x1b0   :  { %v666_v17 = vcombine.low %v523_v60, %v611_v14  ;;  %v667_v18 = vcombine.high %v523_v60, %v611_v14  ;;  %v785_v60 = vrot.slane %v771_v36, %v625_v7 }
 0x1b1   :  { %v1204_v21 = vpop.f32.mrf.mxu1 }
 0x1b2   :  { %v674_v26 = vrot.slane %v666_v17, %v625_v7  ;;  %v1426_v34 = vrot.slane %v667_v18, %v625_v7  ;;  %v834_v9 = vcombine.low %v769_v2, %v785_v60  ;;  %v699_v18 = vcombine.high %v1413_v20, %v1422_v32  ;;  %v36_v32 = vld [vmem:[%s1530_s2] sm:$0x7f] }
 0x1b3   :  { %v614_v29 = vpop.f32.mrf.mxu1  ;;  %v835_v19 = vcombine.high %v769_v2, %v785_v60 }
 0x1b4   :  { %v802_v35 = vcombine.low %v526_v3, %v614_v29  ;;  %v803_v37 = vcombine.high %v526_v3, %v614_v29  ;;  %v715_v39 = vcombine.high %v658_v28, %v674_v26  ;;  %v714_v40 = vcombine.low %v658_v28, %v674_v26 }
 0x1b5   :  { %v1205_v38 = vpop.f32.mrf.mxu1  ;;  %v730_v51 = vcombine.low %v1424_v33, %v1426_v34  ;;  %v731_v14 = vcombine.high %v1424_v33, %v1426_v34  ;;  %v849_v26 = vrot.slane %v835_v19, %v1416_v22  ;;  %v713_v27 = vrot.slane %v699_v18, %v1416_v22 }
 0x1b6   :  { %v810_v44 = vrot.slane %v802_v35, %v625_v7  ;;  %v729_v48 = vrot.slane %v715_v39, %v1416_v22  ;;  %v1438_v50 = vrot.slane %v714_v40, %v1416_v22  ;;  %v817_v55 = vrot.slane %v803_v37, %v625_v7 }
 0x1b7   :  { %v738_v5 = vrot.slane %v730_v51, %v1416_v22  ;;  %v842_v7 = vrot.slane %v834_v9, %v1416_v22  ;;  %v745_v25 = vrot.slane %v731_v14, %v1416_v22 }
 0x1b8   :  { %v850_v52 = vcombine.low %v794_v43, %v810_v44  ;;  %v851_v53 = vcombine.high %v794_v43, %v810_v44  ;;  %v748_v46 = vcombine.low %v697_v47, %v729_v48  ;;  %v747_v54 = vcombine.high %v1435_v49, %v1438_v50 }
 0x1b9   :  { %v746_v56 = vcombine.low %v1435_v49, %v1438_v50  ;;  %v866_v3 = vcombine.low %v801_v62, %v817_v55  ;;  %v749_v4 = vcombine.high %v697_v47, %v729_v48  ;;  %v750_v12 = vcombine.low %v706_v10, %v738_v5  ;;  %v1090_v49 = vld [vmem:[%s1529_s1] ss:$0 sm:$0xff] }
 0x1ba   :  { %v865_v59 = vrot.slane %v851_v53, %v1416_v22  ;;  %895 = vrot.lane.b32.xlu1 %v748_v46, %s1272_s7  ;;  %891 = vrot.lane.b32.xlu0 %v747_v54, %s1273_s19  ;;  %v1452_v63 = vrot.slane %v850_v52, %v1416_v22  ;;  %v867_v15 = vcombine.high %v801_v62, %v817_v55 }
 0x1bb   :  { %v874_v13 = vrot.slane %v866_v3, %v1416_v22  ;;  %v751_v17 = vcombine.high %v706_v10, %v738_v5  ;;  %v752_v28 = vcombine.low %v713_v27, %v745_v25  ;;  %v753_v30 = vcombine.high %v713_v27, %v745_v25 }
 0x1bc   :  { %v884_v0 = vcombine.low %v833_v58, %v865_v59  ;;  %v882_v8 = vcombine.low %v1455_v1, %v1452_v63  ;;  %v885_v11 = vcombine.high %v833_v58, %v865_v59  ;;  %v883_v23 = vcombine.high %v1455_v1, %v1452_v63 }
 0x1bd   :  { %v886_v16 = vcombine.low %v842_v7, %v874_v13  ;;  %v887_v21 = vcombine.high %v842_v7, %v874_v13  ;;  %v881_v24 = vrot.slane %v867_v15, %v1416_v22  ;;  %v34_v22 = vld [vmem:[%s1528_s0] sm:$0x7f]  ;;  %vm64_vm11 = vcmp.eq.s32.totalorder %v1406_v61, %v1090_v49 }
 0x1be   :  { %923 = vrot.lane.b32.xlu1 %v884_v0, %s1272_s7  ;;  %899 = vrot.lane.b32.xlu0 %v749_v4, %s1274_s20  ;;  %v38_v33 = vsel %vm37_vm3, %v34_v22, -inf }
 0x1bf   :  { %v888_v20 = vcombine.low %v849_v26, %v881_v24  ;;  %v889_v29 = vcombine.high %v849_v26, %v881_v24  ;;  %v39_v34 = vrot.slane %v38_v33, 4  ;;  %v1091_v24 = vsel %vm64_vm11, 1.0, %v1267_v6 }
 0x1c1   :  { %v40_v35 = vmax.f32 %v38_v33, %v39_v34 }
 0x1c2   :  { %927 = vrot.lane.b32.xlu1 %v885_v11, %s1274_s20  ;;  %903 = vrot.lane.b32.xlu0 %v750_v12, %s1275_s21 }
 0x1c3   :  { %v41_v36 = vrot.slane %v40_v35, 2 }
 0x1c5   :  { %v42_v37 = vmax.f32 %v40_v35, %v41_v36 }
 0x1c6   :  { %931 = vrot.lane.b32.xlu1 %v886_v16, %s1275_s21  ;;  %907 = vrot.lane.b32.xlu0 %v751_v17, %s1276_s22 }
 0x1c7   :  { %v43_v38 = vrot.slane %v42_v37, 1 }
 0x1c9   :  { %v44_v39 = vmax.f32 %v42_v37, %v43_v38 }
 0x1ca   :  { %935 = vrot.lane.b32.xlu1 %v887_v21, %s1276_s22  ;;  %919 = vrot.lane.b32.xlu0 %v883_v23, %s1273_s19 }
 0x1cb   :  { %v45_v40 = vsub.f32 %v34_v22, %v44_v39 }
 0x1cd   :  { %v46_v41 = vmul.f32 1.442695, %v45_v40 }
 0x1ce   :  { %939 = vrot.lane.b32.xlu1 %v888_v20, %s1277_s23  ;;  %911 = vrot.lane.b32.xlu0 %v752_v28, %s1277_s23 }
 0x1cf   :  { %1237 = vpow2.f32 %v46_v41 }
 0x1d2   :  { %943 = vrot.lane.b32.xlu1 %v889_v29, %s1278_s24  ;;  %915 = vrot.lane.b32.xlu0 %v753_v30, %s1278_s24  ;;  %v128_v29 = vld [vmem:[%s1532_s4] sm:$0xff]  ;;  %v129_v30 = vld [vmem:[%s1532_s4 + $0x8] sm:$0xff] }
 0x1d6   :  { %968 = vperm.xlu0 %1230, %v130_v31   ;;  %78 = vperm.xlu1 %1231, %v36_v32  }
 0x1dc   :  { %v1238_v42 = vpop.eup %1237 }
 0x1dd   :  { %v48_v43 = vsel %vm37_vm3, %v1238_v42, 0.0 }
 0x1de   :  { %v49_v44 = vrot.slane %v48_v43, 4 }
 0x1e0   :  { %v50_v47 = vadd.f32 %v49_v44, %v48_v43 }
 0x1e2   :  { %v51_v48 = vrot.slane %v50_v47, 2 }
 0x1e4   :  { %v52_v45 = vadd.f32 %v51_v48, %v50_v47 }
 0x1e6   :  { %v53_v51 = vrot.slane %v52_v45, 1 }
 0x1e8   :  { %v54_v55 = vadd.f32 %v53_v51, %v52_v45 }
 0x1ea   :  { %1239 = vlog2.f32 %v54_v55 }
 0x1f7   :  { %v1240_v5 = vpop.eup %1239 }
 0x22c   :  { %v896_v52 = vpop.permute.xlu1 %895  ;;  %v892_v53 = vpop.permute.xlu0 %891 }
 0x22d   :  { %v947_v2 = vsel %vm946_vm4, %v746_v56, %v892_v53  ;;  %v56_v56 = vmul.f32 0.6931472, %v1240_v5 }
 0x22e   :  { %v949_v10 = vsel %vm948_vm5, %v947_v2, %v896_v52 }
 0x22f   :  { %v57_v23 = vsub.f32 %v45_v40, %v56_v56 }
 0x230   :  { %v924_v46 = vpop.permute.xlu1 %923  ;;  %v900_v54 = vpop.permute.xlu0 %899 }
 0x231   :  { %v951_v7 = vsel %vm950_vm6, %v949_v10, %v900_v54  ;;  %v67_v28 = vmul.f32 %v1091_v24, %v57_v23 }
 0x233   :  { %v68_v61 = vsel %vm37_vm3, %v67_v28, 0.0 }
 0x234   :  { %v928_v57 = vpop.permute.xlu1 %927  ;;  %v904_v58 = vpop.permute.xlu0 %903  ;;  %v69_v22 = vrot.slane %v68_v61, 4 }
 0x235   :  { %v953_v50 = vsel %vm952_vm7, %v951_v7, %v904_v58 }
 0x236   :  { %v70_v37 = vadd.f32 %v69_v22, %v68_v61 }
 0x238   :  { %v932_v59 = vpop.permute.xlu1 %931  ;;  %v908_v60 = vpop.permute.xlu0 %907  ;;  %v71_v41 = vrot.slane %v70_v37, 2 }
 0x239   :  { %v955_v63 = vsel %vm954_vm8, %v953_v50, %v908_v60 }
 0x23a   :  { %v72_v48 = vadd.f32 %v71_v41, %v70_v37 }
 0x23c   :  { %v936_v62 = vpop.permute.xlu1 %935  ;;  %v920_v0 = vpop.permute.xlu0 %919  ;;  %v73_v51 = vrot.slane %v72_v48, 1 }
 0x23d   :  { %v960_v3 = vsel %vm946_vm4, %v882_v8, %v920_v0 }
 0x23e   :  { %v961_v4 = vsel %vm948_vm5, %v960_v3, %v924_v46  ;;  %v74_v52 = vadd.f32 %v73_v51, %v72_v48  ;;  %v131_v51 = vld [vmem:[%s1534_s6] sm:$0xff] }
 0x23f   :  { %v962_v9 = vsel %vm950_vm6, %v961_v4, %v928_v57 }
 0x240   :  { %v940_v11 = vpop.permute.xlu1 %939  ;;  %v963_v12 = vsel %vm952_vm7, %v962_v9, %v932_v59  ;;  %v912_v13 = vpop.permute.xlu0 %911  ;;  %v75_v58 = vsub.f32 0.0, %v74_v52 }
 0x241   :  { %v964_v14 = vsel %vm954_vm8, %v963_v12, %v936_v62  ;;  %v957_v8 = vsel %vm956_vm9, %v955_v63, %v912_v13 }
 0x242   :  { %v965_v1 = vsel %vm956_vm9, %v964_v14, %v940_v11 }
 0x244   :  { %v944_v15 = vpop.permute.xlu1 %943  ;;  %v916_v16 = vpop.permute.xlu0 %915 }
 0x245   :  { %v1495_v17 = vsel %vm958_vm10, %v965_v1, %v944_v15  ;;  %v1497_v18 = vsel %vm958_vm10, %v957_v8, %v916_v16 }
 0x246   :  { %v977_v19 = vand.u32 2147483647, %v1495_v17  ;;  %v976_v21 = vand.u32 2147483647, %v1497_v18  ;;  %vm989_vm14 = vcmp.ge.f32.partialorder %v1495_v17, 0.0  ;;  %v995_v57 = vmax.f32 %v1495_v17, 0.0 }
 0x247   :  { %vm988_vm15 = vcmp.ge.f32.partialorder %v1497_v18, 0.0  ;;  %v994_v60 = vmax.f32 %v1497_v18, 0.0 }
 0x248   :  { %v979_v25 = vsub.f32 0.0, %v977_v19  ;;  %v978_v26 = vsub.f32 0.0, %v976_v21 }
 0x24a   :  { %v982_v27 = vmul.f32 1.442695, %v979_v25  ;;  %v980_v20 = vmul.f32 1.442695, %v978_v26 }
 0x24c   :  { %1241 = vpow2.f32 %v982_v27 }
 0x24d   :  { %1243 = vpow2.f32 %v980_v20 }
 0x251   :  { %v969_v31 = vpop.permute.xlu0 %968  ;;  %v79_v32 = vpop.permute.xlu1 %78 }
 0x252   :  { %vm970_vm12 = vcmp.eq.s32.totalorder %v128_v29, %v969_v31  ;;  %vm971_vm13 = vcmp.eq.s32.totalorder %v129_v30, %v969_v31  ;;  %v81_v33 = vmul.f32 %v1091_v24, %v79_v32 }
 0x253   :  { %v1117_v34 = vsel %vm970_vm12, 1.0, %v1267_v6  ;;  %v1118_v35 = vsel %vm971_vm13, 1.0, %v1267_v6 }
 0x254   :  { %v1040_v36 = vadd.f32 %v1118_v35, %v1117_v34  ;;  %v82_v38 = vsel %vm37_vm3, %v81_v33, 0.0  ;;  %v1010_v55 = vsub.f32 1.0, %v1117_v34  ;;  %v1011_v46 = vsub.f32 1.0, %v1118_v35 }
 0x255   :  { %v83_v39 = vrot.slane %v82_v38, 4  ;;  %v996_v62 = vmul.f32 %v1117_v34, %v1497_v18  ;;  %v997_v3 = vmul.f32 %v1118_v35, %v1495_v17  ;;  %v1018_v4 = vmul.f32 0.25, %v1117_v34 }
 0x256   :  { %1041 = vadd.xlane.f32.xlu0 %v1040_v36  ;;  %v1019_v11 = vmul.f32 0.25, %v1118_v35  ;;  %v1020_v13 = vmul.f32 0.75, %v1010_v55  ;;  %v1021_v7 = vmul.f32 0.75, %v1011_v46 }
 0x257   :  { %v84_v47 = vadd.f32 %v83_v39, %v82_v38  ;;  %v999_v18 = vsub.f32 %v995_v57, %v997_v3  ;;  %v998_v23 = vsub.f32 %v994_v60, %v996_v62 }
 0x258   :  { %v1023_v26 = vadd.f32 %v1021_v7, %v1019_v11  ;;  %v1022_v28 = vadd.f32 %v1020_v13, %v1018_v4 }
 0x259   :  { %v1242_v40 = vpop.eup %1241  ;;  %v85_v45 = vrot.slane %v84_v47, 2 }
 0x25a   :  { %v1244_v42 = vpop.eup %1243  ;;  %v985_v43 = vadd.f32 1.0, %v1242_v40 }
 0x25b   :  { %v984_v44 = vadd.f32 1.0, %v1244_v42  ;;  %v86_v6 = vadd.f32 %v85_v45, %v84_v47 }
 0x25c   :  { %1245 = vrcp.f32 %v985_v43 }
 0x25d   :  { %1247 = vrcp.f32 %v984_v44  ;;  %v87_v53 = vrot.slane %v86_v6, 1 }
 0x25e   :  { %1249 = vlog2.f32 %v984_v44 }
 0x25f   :  { %1251 = vlog2.f32 %v985_v43  ;;  %v88_v9 = vadd.f32 %v87_v53, %v86_v6 }
 0x261   :  { %v89_v19 = vmul.f32 %v88_v9, %v75_v58  ;;  %v101_v37 = vsel %vm90_vm0, %v88_v9, 0.0 }
 0x263   :  { %v91_v29 = vsel %vm90_vm0, %v89_v19, 0.0 }
 0x269   :  { %v1246_v54 = vpop.eup %1245 }
 0x26a   :  { %v1248_v59 = vpop.eup %1247  ;;  %v991_v0 = vmul.f32 %v1246_v54, %v1242_v40 }
 0x26b   :  { %v1250_v2 = vpop.eup %1249  ;;  %v990_v5 = vmul.f32 %v1248_v59, %v1244_v42 }
 0x26c   :  { %v1252_v10 = vpop.eup %1251  ;;  %v993_v12 = vsel %vm989_vm14, %v1246_v54, %v991_v0  ;;  %v1001_v15 = vmul.f32 0.6931472, %v1250_v2 }
 0x26d   :  { %v992_v14 = vsel %vm988_vm15, %v1248_v59, %v990_v5  ;;  %v1009_v49 = vsub.f32 1.0, %v993_v12  ;;  %v1007_v50 = vmul.f32 %v1118_v35, %v993_v12  ;;  %v1003_v56 = vmul.f32 0.6931472, %v1252_v10 }
 0x26e   :  { %v1008_v63 = vsub.f32 1.0, %v992_v14  ;;  %v1037_v1 = vadd.f32 %v993_v12, %v992_v14  ;;  %v1006_v8 = vmul.f32 %v1117_v34, %v992_v14  ;;  %v1004_v20 = vadd.f32 %v1001_v15, %v998_v23 }
 0x26f   :  { %v1013_v16 = vmul.f32 %v1011_v46, %v1009_v49  ;;  %v1005_v25 = vadd.f32 %v1003_v56, %v999_v18 }
 0x270   :  { %1038 = vadd.xlane.f32.xlu1 %v1037_v1  ;;  %v1012_v17 = vmul.f32 %v1010_v55, %v1008_v63  ;;  %v1034_v21 = vadd.f32 %v1007_v50, %v1006_v8  ;;  %v1024_v22 = vmul.f32 %v1022_v28, %v1004_v20 }
 0x271   :  { %v1015_v24 = vadd.f32 %v1013_v16, %v1007_v50  ;;  %v1025_v31 = vmul.f32 %v1023_v26, %v1005_v25 }
 0x272   :  { %1035 = vadd.xlane.f32.xlu0 %v1034_v21  ;;  %v1014_v27 = vadd.f32 %v1012_v17, %v1006_v8 }
 0x273   :  { %v1017_v61 = vsub.f32 1.0, %v1015_v24 }
 0x274   :  { %v1016_v30 = vsub.f32 1.0, %v1014_v27 }
 0x275   :  { %v1027_v32 = vmul.f32 %v1017_v61, %v1017_v61 }
 0x276   :  { %v1026_v33 = vmul.f32 %v1016_v30, %v1016_v30  ;;  %92 = vadd.xlane.f32.xlu0 %v91_v29 }
 0x277   :  { %v1029_v34 = vmul.f32 %v1027_v32, %v1025_v31 }
 0x278   :  { %v1028_v35 = vmul.f32 %v1026_v33, %v1024_v22 }
 0x27a   :  { %v1030_v36 = vadd.f32 %v1029_v34, %v1028_v35 }
 0x27c   :  { %1031 = vadd.xlane.f32.xlu1 %v1030_v36 }
 0x280   :  { %102 = vadd.xlane.f32.xlu1 %v101_v37 }
 0x2df   :  { %v1042_v38 = vpop.xlane.xlu0 %1041 }
 0x2f9   :  { %v1039_v39 = vpop.xlane.xlu1 %1038 }
 0x2fa   :  { %v1043_v40 = vadd.f32 %v1042_v38, %v1039_v39 }
 0x2fb   :  { %v1036_v41 = vpop.xlane.xlu0 %1035 }
 0x2fc   :  { %v1046_v42 = vadd.f32 1.0, %v1043_v40  ;;  %v1044_v6 = vmul.f32 2.0, %v1036_v41 }
 0x2fe   :  { %1253 = vrcp.f32 %v1046_v42  ;;  %v1045_v57 = vadd.f32 1.0, %v1044_v6 }
 0x2ff   :  { %v93_v43 = vpop.xlane.xlu0 %92 }
 0x300   :  { %v94_v44 = vrot.slane %v93_v43, 4 }
 0x302   :  { %v95_v47 = vadd.f32 %v94_v44, %v93_v43 }
 0x304   :  { %v96_v48 = vrot.slane %v95_v47, 2 }
 0x305   :  { %v1032_v45 = vpop.xlane.xlu1 %1031 }
 0x306   :  { %v1033_v52 = vmul.f32 0.00390625, %v1032_v45  ;;  %v97_v53 = vadd.f32 %v96_v48, %v95_v47 }
 0x308   :  { %v1050_v55 = vmul.f32 %v1033_v52, %v131_v51  ;;  %v98_v46 = vrot.slane %v97_v53, 1 }
 0x309   :  { %v103_v54 = vpop.xlane.xlu1 %102 }
 0x30a   :  { %v1052_v58 = vsel %vm1051_vm1, %v1050_v55, 0.0  ;;  %v104_v59 = vrot.slane %v103_v54, 4  ;;  %v99_v60 = vadd.f32 %v98_v46, %v97_v53 }
 0x30b   :  { %v1254_v62 = vpop.eup %1253  ;;  %1053 = vadd.xlane.f32.xlu0 %v1052_v58 }
 0x30c   :  { %v1048_v0 = vmul.f32 %v1254_v62, %v1045_v57  ;;  %v105_v2 = vadd.f32 %v104_v59, %v103_v54  ;;  %1207 = vpush %v99_v60 }
 0x30e   :  { %v1049_v3 = vsub.f32 1.0, %v1048_v0  ;;  %v106_v4 = vrot.slane %v105_v2, 2 }
 0x310   :  { %v1064_v5 = vmul.f32 %v1049_v3, %v131_v51  ;;  %v107_v9 = vadd.f32 %v106_v4, %v105_v2 }
 0x312   :  { %v1065_v10 = vsel %vm1051_vm1, %v1064_v5, 0.0  ;;  %v108_v11 = vrot.slane %v107_v9, 1 }
 0x313   :  { %1066 = vadd.xlane.f32.xlu1 %v1065_v10 }
 0x314   :  { %v109_v12 = vadd.f32 %v108_v11, %v107_v9 }
 0x316   :  { %1209 = vpush %v109_v12 }
 0x33d   :  { %s1208_s6 = spop %1207 }
 0x347   :  { %s1210_s13 = spop %1209 }
 0x348   :  { %v111_v13 = vstv %s1210_s13 }
 0x349   :  { %1255 = vrcp.f32 %v111_v13 }
 0x356   :  { %v1256_v7 = vpop.eup %1255 }
 0x357   :  { %1211 = vpush %v1256_v7 }
 0x388   :  { %s1212_s14 = spop %1211 }
 0x389   :  { %s114_s15 = smul.f32 %s1212_s14, %s1208_s6 }
 0x38b   :  { %116 = sst [smem:[#allocation2]] %s114_s15 }
 0x394   :  { %v1054_v14 = vpop.xlane.xlu0 %1053 }
 0x395   :  { %v1055_v49 = vrot.slane %v1054_v14, 4 }
 0x397   :  { %v1056_v50 = vadd.f32 %v1055_v49, %v1054_v14 }
 0x399   :  { %v1057_v56 = vrot.slane %v1056_v50, 2 }
 0x39b   :  { %v1058_v63 = vadd.f32 %v1057_v56, %v1056_v50 }
 0x39c   :  { %v1067_v1 = vpop.xlane.xlu1 %1066 }
 0x39d   :  { %v1068_v8 = vrot.slane %v1067_v1, 4  ;;  %v1059_v15 = vrot.slane %v1058_v63, 1 }
 0x39f   :  { %v1069_v16 = vadd.f32 %v1068_v8, %v1067_v1  ;;  %v1060_v18 = vadd.f32 %v1059_v15, %v1058_v63 }
 0x3a1   :  { %v1070_v19 = vrot.slane %v1069_v16, 2  ;;  %1213 = vpush %v1060_v18 }
 0x3a3   :  { %v1071_v17 = vadd.f32 %v1070_v19, %v1069_v16 }
 0x3a5   :  { %v1072_v21 = vrot.slane %v1071_v17, 1 }
 0x3a7   :  { %v1073_v23 = vadd.f32 %v1072_v21, %v1071_v17 }
 0x3a9   :  { %1215 = vpush %v1073_v23 }
 0x3d2   :  { %s1214_s16 = spop %1213 }
 0x3d3   :  { %1063 = sst [smem:[#allocation2 + $0x1]] %s1214_s16 }
 0x3da   :  { %s1216_s8 = spop %1215 }
 0x3db   :  { %1076 = sst [smem:[#allocation2 + $0x2]] %s1216_s8 }
 0x3dc   :  { %1084 = dma.smem_to_hbm %s1279_s17, 16, %s1537_s9, [#allocation3]  }
 0x3dd   :  { %1265 = dma.done.wait [#allocation3], 16  }
 0x3de   :  { %1266 = vsyncadd [#allocation3], 4294967280 }
 0x3df   :  { %1088 = sfence }
 0x3e0   :  { %1089 = vsyncpa [#allocation3], 1 }

</bundles_post_ra>
